<compile_context>
chip_gen: v6e
topology: v6e:2x2x1
jax: 0.10.0
libtpu: 0.0.40
codegen_flags: <defaults>
</compile_context>

<pallas_src>
import functools

import jax
import jax.numpy as jnp
from jax.experimental import pallas as pl
from jax.experimental.pallas import tpu as pltpu


def _lstm_seq_kernel(x_ref, s0_ref, w0x_ref, w0h_ref, *rest, num_layers, hidden):
    """One grid step == one time step; all layers unrolled; state resident in out_ref.

    x_ref:   (1, B, In)        current time-step input block
    s0_ref:  (B, S_pad)        initial state slab [h_0..h_{L-1} | c_0..c_{L-1} | pad]
    w0x_ref: (In, 4H) bf16     layer-0 W_ih^T (gate cols permuted to [i|f|o|g])
    w0h_ref: (H, 4H)  bf16     layer-0 W_hh^T
    wrx_ref: (L-1, H, 4H) bf16 layers>=1 W_ih^T   (only if num_layers > 1)
    wrh_ref: (L-1, H, 4H) bf16 layers>=1 W_hh^T   (only if num_layers > 1)
    b_ref:   (L, 1, 4H) f32    b_ih + b_hh per layer (permuted)
    out_ref: (B, S_pad) f32    state slab; same layout as s0_ref; written every step,
                               flushed to HBM once (constant output block index)
    """
    if num_layers > 1:
        wrx_ref, wrh_ref, b_ref, out_ref = rest
    else:
        wrx_ref = wrh_ref = None
        b_ref, out_ref = rest

    L, H = num_layers, hidden
    B = out_ref.shape[0]
    S = 2 * L * H
    S_pad = out_ref.shape[1]
    t = pl.program_id(0)

    # Load the initial state into the VMEM-resident output block exactly once.
    @pl.when(t == 0)
    def _():
        out_ref[...] = s0_ref[...]

    state = out_ref[...]                 # (B, S_pad) f32 — previous-step h/c
    x = x_ref[0]                         # (B, In)     f32 — this step's input

    def cell(x_in, h_prev, c_prev, wx, wh, b):
        # bf16 MXU inputs, f32 accumulation; elementwise gate math stays f32.
        gates = (jnp.dot(x_in.astype(wx.dtype), wx, preferred_element_type=jnp.float32)
                 + jnp.dot(h_prev.astype(wh.dtype), wh, preferred_element_type=jnp.float32)
                 + b)
        ifo = jax.nn.sigmoid(gates[:, :3 * H])   # gate columns are [i | f | o | g]
        g = jnp.tanh(gates[:, 3 * H:])
        i = ifo[:, :H]
        f = ifo[:, H:2 * H]
        o = ifo[:, 2 * H:]
        c_new = f * c_prev + i * g
        h_new = o * jnp.tanh(c_new)
        return h_new, c_new

    inp = x
    new_h, new_c = [], []
    for l in range(L):                   # statically unrolled (L is small & static)
        h_prev = state[:, l * H:(l + 1) * H]
        c_prev = state[:, (L + l) * H:(L + l + 1) * H]
        wx = w0x_ref[...] if l == 0 else wrx_ref[l - 1]
        wh = w0h_ref[...] if l == 0 else wrh_ref[l - 1]
        h_l, c_l = cell(inp, h_prev, c_prev, wx, wh, b_ref[l])
        new_h.append(h_l)
        new_c.append(c_l)
        inp = h_l

    packed = jnp.concatenate(new_h + new_c, axis=-1)         # (B, 2*L*H)
    if S_pad > S:
        packed = jnp.concatenate(
            [packed, jnp.zeros((B, S_pad - S), jnp.float32)], axis=-1)
    out_ref[...] = packed                 # lane-dense full-block store


@functools.partial(jax.jit, static_argnames=("num_layers", "hidden"))
def _lstm_forward_fused(xs, h0, c0, w0x, w0h, wrx, wrh, b, *, num_layers, hidden):
    """Run T = xs.shape[0] LSTM steps fused in a single pallas_call."""
    T, B, In = xs.shape
    L, H = num_layers, hidden
    S = 2 * L * H
    S_pad = max(128, ((S + 127) // 128) * 128)   # keep the output store lane-dense

    # Sequence-boundary layout plumbing only: (L,B,H) -> (B, 2*L*H[+pad]) slab.
    h_cols = jnp.transpose(h0, (1, 0, 2)).reshape(B, L * H)
    c_cols = jnp.transpose(c0, (1, 0, 2)).reshape(B, L * H)
    s0 = jnp.concatenate([h_cols, c_cols], axis=-1).astype(jnp.float32)
    if S_pad > S:
        s0 = jnp.pad(s0, ((0, 0), (0, S_pad - S)))

    def whole(arr):
        nd = arr.ndim
        return pl.BlockSpec(arr.shape, lambda t, _nd=nd: (0,) * _nd)

    in_specs = [
        pl.BlockSpec((1, B, In), lambda t: (t, 0, 0)),  # x: one time step per grid step
        whole(s0),                                      # initial state, VMEM once
        whole(w0x), whole(w0h),                         # weights resident in VMEM
    ]
    operands = [xs.astype(jnp.float32), s0, w0x, w0h]
    if L > 1:
        in_specs += [whole(wrx), whole(wrh)]
        operands += [wrx, wrh]
    in_specs.append(whole(b))
    operands.append(b)

    kern = functools.partial(_lstm_seq_kernel, num_layers=L, hidden=H)

    out = pl.pallas_call(
        kern,
        grid=(T,),
        in_specs=in_specs,
        out_specs=pl.BlockSpec((B, S_pad), lambda t: (0, 0)),   # resident accumulator
        out_shape=jax.ShapeDtypeStruct((B, S_pad), jnp.float32),
        input_output_aliases={1: 0},                            # state written in place
        compiler_params=pltpu.CompilerParams(
            dimension_semantics=("arbitrary",)),                # recurrence over T
    )(*operands)

    h_n = out[:, :L * H].reshape(B, L, H).transpose(1, 0, 2)    # (L, B, H)
    c_n = out[:, L * H:S].reshape(B, L, H).transpose(1, 0, 2)   # (L, B, H)
    return h_n[-1], h_n, c_n


class LSTMControllerPallas:
    """JAX/Pallas equivalent of the PyTorch LSTMController."""

    def __init__(self, num_inputs, num_outputs, num_layers, key):
        self.num_inputs = num_inputs
        self.num_outputs = num_outputs
        self.num_layers = num_layers

        H = num_outputs
        scale = 1.0 / float(H) ** 0.5
        # PyTorch gate order is [i, f, g, o]; permute columns to [i, f, o, g] so the
        # kernel applies one sigmoid over 3H lanes and one tanh over H lanes.
        perm = jnp.concatenate([jnp.arange(0, 2 * H),
                                jnp.arange(3 * H, 4 * H),
                                jnp.arange(2 * H, 3 * H)])

        w0x = w0h = None
        wrx_list, wrh_list, b_list = [], [], []
        for layer in range(num_layers):
            in_dim = num_inputs if layer == 0 else H
            key, k1, k2, k3, k4 = jax.random.split(key, 5)
            # nn.LSTM init: U(-1/sqrt(H), 1/sqrt(H)).
            w_ih = jax.random.uniform(k1, (4 * H, in_dim), jnp.float32, -scale, scale)
            w_hh = jax.random.uniform(k2, (4 * H, H), jnp.float32, -scale, scale)
            b_ih = jax.random.uniform(k3, (4 * H,), jnp.float32, -scale, scale)
            b_hh = jax.random.uniform(k4, (4 * H,), jnp.float32, -scale, scale)
            wx = w_ih.T[:, perm].astype(jnp.bfloat16)           # (in_dim, 4H)
            wh = w_hh.T[:, perm].astype(jnp.bfloat16)           # (H, 4H)
            if layer == 0:
                w0x, w0h = wx, wh
            else:
                wrx_list.append(wx)
                wrh_list.append(wh)
            b_list.append((b_ih + b_hh)[perm].reshape(1, 4 * H))

        self.w0x, self.w0h = w0x, w0h
        self.wrx = jnp.stack(wrx_list) if wrx_list else None    # (L-1, H, 4H) or None
        self.wrh = jnp.stack(wrh_list) if wrh_list else None
        self.b = jnp.stack(b_list)                              # (L, 1, 4H) f32

    def create_new_state(self, batch_size):
        h = jnp.zeros((self.num_layers, batch_size, self.num_outputs), jnp.float32)
        c = jnp.zeros((self.num_layers, batch_size, self.num_outputs), jnp.float32)
        return (h, c)

    def size(self):
        return (self.num_inputs, self.num_outputs)

    def forward(self, x, prev_state, prev_reads=None, class_vector=None, seq=1):
        # Matches the PyTorch module: one LSTM step over a length-1 sequence.
        assert seq == 1  # TODO(synk): seq>1 path in the original module is ill-formed.
        h_prev, c_prev = prev_state
        top, h_n, c_n = _lstm_forward_fused(
            x[None].astype(jnp.float32),
            h_prev.astype(jnp.float32), c_prev.astype(jnp.float32),
            self.w0x, self.w0h, self.wrx, self.wrh, self.b,
            num_layers=self.num_layers, hidden=self.num_outputs)
        return top, (h_n, c_n)

    def forward_steps(self, xs, prev_state):
        """Fused multi-step path: all T steps in one pallas_call (weights loaded once)."""
        h_prev, c_prev = prev_state
        top, h_n, c_n = _lstm_forward_fused(
            xs.astype(jnp.float32),
            h_prev.astype(jnp.float32), c_prev.astype(jnp.float32),
            self.w0x, self.w0h, self.wrx, self.wrh, self.b,
            num_layers=self.num_layers, hidden=self.num_outputs)
        return top, (h_n, c_n)


def _lstm_ref(ctrl, xs, h0, c0):
    """Pure-JAX reference replicating the kernel math (same bf16 weights, f32 state)."""
    L, H = ctrl.num_layers, ctrl.num_outputs
    h = [h0[l] for l in range(L)]
    c = [c0[l] for l in range(L)]
    top = None
    for t in range(xs.shape[0]):
        inp = xs[t]
        for l in range(L):
            wx = ctrl.w0x if l == 0 else ctrl.wrx[l - 1]
            wh = ctrl.w0h if l == 0 else ctrl.wrh[l - 1]
            gates = (jnp.dot(inp.astype(wx.dtype), wx, preferred_element_type=jnp.float32)
                     + jnp.dot(h[l].astype(wh.dtype), wh, preferred_element_type=jnp.float32)
                     + ctrl.b[l])
            i = jax.nn.sigmoid(gates[:, :H])
            f = jax.nn.sigmoid(gates[:, H:2 * H])
            o = jax.nn.sigmoid(gates[:, 2 * H:3 * H])
            g = jnp.tanh(gates[:, 3 * H:])
            c[l] = f * c[l] + i * g
            h[l] = o * jnp.tanh(c[l])
            inp = h[l]
        top = inp
    return top, (jnp.stack(h), jnp.stack(c))


if __name__ == "__main__":
    num_inputs, num_outputs, num_layers = 16, 32, 2
    batch, seq_len = 4, 8

    key = jax.random.PRNGKey(0)
    key, kx, ks = jax.random.split(key, 3)

    ctrl = LSTMControllerPallas(num_inputs, num_outputs, num_layers, key)
    prev_state = ctrl.create_new_state(batch)

    # --- module-semantics path: one step (seq=1) ---
    x = jax.random.normal(kx, (batch, num_inputs), jnp.float32)
    out, (h_n, c_n) = ctrl.forward(x, prev_state, seq=1)
    jax.block_until_ready((out, h_n, c_n))

    assert out.shape == (batch, num_outputs)
    assert h_n.shape == (num_layers, batch, num_outputs)
    assert c_n.shape == (num_layers, batch, num_outputs)
    ref_out, (ref_h, ref_c) = _lstm_ref(ctrl, x[None], *prev_state)
    assert bool(jnp.allclose(out, ref_out, atol=2e-3, rtol=2e-3))
    assert bool(jnp.allclose(h_n, ref_h, atol=2e-3, rtol=2e-3))
    assert bool(jnp.allclose(c_n, ref_c, atol=2e-3, rtol=2e-3))

    # --- fused multi-step path: whole sequence in ONE pallas_call ---
    xs = jax.random.normal(ks, (seq_len, batch, num_inputs), jnp.float32)
    out_s, (h_s, c_s) = ctrl.forward_steps(xs, prev_state)
    jax.block_until_ready((out_s, h_s, c_s))

    ref_out_s, (ref_h_s, ref_c_s) = _lstm_ref(ctrl, xs, *prev_state)
    assert bool(jnp.allclose(out_s, ref_out_s, atol=5e-3, rtol=5e-3))
    assert bool(jnp.allclose(h_s, ref_h_s, atol=5e-3, rtol=5e-3))
    assert bool(jnp.allclose(c_s, ref_c_s, atol=5e-3, rtol=5e-3))

    print("KERNEL_OK")
</pallas_src>

<mosaic_0001>
module attributes {stable_mosaic.version = 11 : i64} {
  func.func @_lstm_seq_kernel(%arg0: i32, %arg1: memref<1x4x16xf32, #tpu.memory_space<vmem>>, %arg2: memref<4x128xf32, #tpu.memory_space<vmem>>, %arg3: memref<16x128xbf16, #tpu.memory_space<vmem>>, %arg4: memref<32x128xbf16, #tpu.memory_space<vmem>>, %arg5: memref<1x32x128xbf16, #tpu.memory_space<vmem>>, %arg6: memref<1x32x128xbf16, #tpu.memory_space<vmem>>, %arg7: memref<2x1x128xf32, #tpu.memory_space<vmem>>, %arg8: memref<4x128xf32, #tpu.memory_space<vmem>>) attributes {dimension_semantics = [#tpu.dimension_semantics<arbitrary>], iteration_bounds = array<i64: 1>, scalar_prefetch = 0 : i64, scratch_operands = 0 : i64, tpu.core_type = #tpu.core_type<tc>, window_params = [{transform_indices = @transform_0, window_bounds = array<i64: 1, 4, 16>}, {pipeline_mode = #tpu.pipeline_mode<synchronous>, transform_indices = @transform_1, window_bounds = array<i64: 4, 128>}, {pipeline_mode = #tpu.pipeline_mode<synchronous>, transform_indices = @transform_2, window_bounds = array<i64: 16, 128>}, {pipeline_mode = #tpu.pipeline_mode<synchronous>, transform_indices = @transform_3, window_bounds = array<i64: 32, 128>}, {pipeline_mode = #tpu.pipeline_mode<synchronous>, transform_indices = @transform_4, window_bounds = array<i64: 1, 32, 128>}, {pipeline_mode = #tpu.pipeline_mode<synchronous>, transform_indices = @transform_5, window_bounds = array<i64: 1, 32, 128>}, {pipeline_mode = #tpu.pipeline_mode<synchronous>, transform_indices = @transform_6, window_bounds = array<i64: 2, 1, 128>}, {pipeline_mode = #tpu.pipeline_mode<synchronous>, transform_indices = @transform_7, window_bounds = array<i64: 4, 128>}]} {
    %c0_i32 = arith.constant 0 : i32
    %0 = arith.cmpi eq, %arg0, %c0_i32 : i32
    %1 = arith.extui %0 : i1 to i32
    %c0_i32_0 = arith.constant 0 : i32
    %2 = arith.cmpi ne, %1, %c0_i32_0 : i32
    scf.if %2 {
      %c0_27 = arith.constant 0 : index
      %c0_28 = arith.constant 0 : index
      %68 = vector.load %arg2[%c0_27, %c0_28] : memref<4x128xf32, #tpu.memory_space<vmem>>, vector<4x128xf32>
      %c0_29 = arith.constant 0 : index
      %c0_30 = arith.constant 0 : index
      %69 = vector.load %arg8[%c0_29, %c0_30] : memref<4x128xf32, #tpu.memory_space<vmem>>, vector<4x128xf32>
      tpu.vector_store %arg8[%c0_29, %c0_30], %68 {strides = array<i32>} : memref<4x128xf32, #tpu.memory_space<vmem>>, vector<4x128xf32>,
    } else {
    }
    %c0 = arith.constant 0 : index
    %c0_1 = arith.constant 0 : index
    %3 = vector.load %arg8[%c0, %c0_1] : memref<4x128xf32, #tpu.memory_space<vmem>>, vector<4x128xf32>
    %c0_2 = arith.constant 0 : index
    %c0_3 = arith.constant 0 : index
    %c0_4 = arith.constant 0 : index
    %4 = vector.load %arg1[%c0_2, %c0_3, %c0_4] : memref<1x4x16xf32, #tpu.memory_space<vmem>>, vector<1x4x16xf32>
    %5 = vector.shape_cast %4 : vector<1x4x16xf32> to vector<4x16xf32>
    %6 = vector.extract_strided_slice %3 {offsets = [0, 0], sizes = [4, 32], strides = [1, 1]} : vector<4x128xf32> to vector<4x32xf32>
    %7 = vector.extract_strided_slice %3 {offsets = [0, 64], sizes = [4, 32], strides = [1, 1]} : vector<4x128xf32> to vector<4x32xf32>
    %c0_5 = arith.constant 0 : index
    %c0_6 = arith.constant 0 : index
    %8 = vector.load %arg3[%c0_5, %c0_6] : memref<16x128xbf16, #tpu.memory_space<vmem>>, vector<16x128xbf16>
    %c0_7 = arith.constant 0 : index
    %c0_8 = arith.constant 0 : index
    %9 = vector.load %arg4[%c0_7, %c0_8] : memref<32x128xbf16, #tpu.memory_space<vmem>>, vector<32x128xbf16>
    %c0_9 = arith.constant 0 : index
    %c0_10 = arith.constant 0 : index
    %c0_11 = arith.constant 0 : index
    %10 = vector.load %arg7[%c0_9, %c0_10, %c0_11] : memref<2x1x128xf32, #tpu.memory_space<vmem>>, vector<1x1x128xf32>
    %11 = vector.shape_cast %10 : vector<1x1x128xf32> to vector<1x128xf32>
    %12 = arith.truncf %5 : vector<4x16xf32> to vector<4x16xbf16>
    %cst = arith.constant dense<0.000000e+00> : vector<4x128xf32>
    %13 = tpu.matmul %12, %8, %cst {dimension_numbers = #tpu.dot_dimension_numbers<[1], [0], [0], [1], [0, 0, 1, 1], [], []>} : vector<4x16xbf16>, vector<16x128xbf16>, vector<4x128xf32> -> vector<4x128xf32>
    %14 = arith.truncf %6 : vector<4x32xf32> to vector<4x32xbf16>
    %cst_12 = arith.constant dense<0.000000e+00> : vector<4x128xf32>
    %15 = tpu.matmul %14, %9, %cst_12 {dimension_numbers = #tpu.dot_dimension_numbers<[1], [0], [0], [1], [0, 0, 1, 1], [], []>} : vector<4x32xbf16>, vector<32x128xbf16>, vector<4x128xf32> -> vector<4x128xf32>
    %16 = arith.addf %13, %15 : vector<4x128xf32>
    %17 = vector.broadcast %11 : vector<1x128xf32> to vector<4x128xf32>
    %18 = arith.addf %16, %17 : vector<4x128xf32>
    %19 = vector.extract_strided_slice %18 {offsets = [0, 0], sizes = [4, 96], strides = [1, 1]} : vector<4x128xf32> to vector<4x96xf32>
    %20 = arith.negf %19 : vector<4x96xf32>
    %21 = math.exp %20 : vector<4x96xf32>
    %cst_13 = arith.constant 1.000000e+00 : f32
    %22 = vector.broadcast %cst_13 : f32 to vector<4x96xf32>
    %23 = arith.addf %22, %21 : vector<4x96xf32>
    %24 = arith.divf %22, %23 : vector<4x96xf32>
    %25 = vector.extract_strided_slice %18 {offsets = [0, 96], sizes = [4, 32], strides = [1, 1]} : vector<4x128xf32> to vector<4x32xf32>
    %26 = math.tanh %25 : vector<4x32xf32>
    %27 = vector.extract_strided_slice %24 {offsets = [0, 0], sizes = [4, 32], strides = [1, 1]} : vector<4x96xf32> to vector<4x32xf32>
    %28 = vector.extract_strided_slice %24 {offsets = [0, 32], sizes = [4, 32], strides = [1, 1]} : vector<4x96xf32> to vector<4x32xf32>
    %29 = vector.extract_strided_slice %24 {offsets = [0, 64], sizes = [4, 32], strides = [1, 1]} : vector<4x96xf32> to vector<4x32xf32>
    %30 = arith.mulf %28, %7 : vector<4x32xf32>
    %31 = arith.mulf %27, %26 : vector<4x32xf32>
    %32 = arith.addf %30, %31 : vector<4x32xf32>
    %33 = math.tanh %32 : vector<4x32xf32>
    %34 = arith.mulf %29, %33 : vector<4x32xf32>
    %35 = vector.extract_strided_slice %3 {offsets = [0, 32], sizes = [4, 32], strides = [1, 1]} : vector<4x128xf32> to vector<4x32xf32>
    %36 = vector.extract_strided_slice %3 {offsets = [0, 96], sizes = [4, 32], strides = [1, 1]} : vector<4x128xf32> to vector<4x32xf32>
    %c0_14 = arith.constant 0 : index
    %c0_15 = arith.constant 0 : index
    %c0_16 = arith.constant 0 : index
    %37 = vector.load %arg5[%c0_14, %c0_15, %c0_16] : memref<1x32x128xbf16, #tpu.memory_space<vmem>>, vector<1x32x128xbf16>
    %38 = vector.shape_cast %37 : vector<1x32x128xbf16> to vector<32x128xbf16>
    %c0_17 = arith.constant 0 : index
    %c0_18 = arith.constant 0 : index
    %c0_19 = arith.constant 0 : index
    %39 = vector.load %arg6[%c0_17, %c0_18, %c0_19] : memref<1x32x128xbf16, #tpu.memory_space<vmem>>, vector<1x32x128xbf16>
    %40 = vector.shape_cast %39 : vector<1x32x128xbf16> to vector<32x128xbf16>
    %c1 = arith.constant 1 : index
    %c0_20 = arith.constant 0 : index
    %c0_21 = arith.constant 0 : index
    %41 = vector.load %arg7[%c1, %c0_20, %c0_21] : memref<2x1x128xf32, #tpu.memory_space<vmem>>, vector<1x1x128xf32>
    %42 = vector.shape_cast %41 : vector<1x1x128xf32> to vector<1x128xf32>
    %43 = arith.truncf %34 : vector<4x32xf32> to vector<4x32xbf16>
    %cst_22 = arith.constant dense<0.000000e+00> : vector<4x128xf32>
    %44 = tpu.matmul %43, %38, %cst_22 {dimension_numbers = #tpu.dot_dimension_numbers<[1], [0], [0], [1], [0, 0, 1, 1], [], []>} : vector<4x32xbf16>, vector<32x128xbf16>, vector<4x128xf32> -> vector<4x128xf32>
    %45 = arith.truncf %35 : vector<4x32xf32> to vector<4x32xbf16>
    %cst_23 = arith.constant dense<0.000000e+00> : vector<4x128xf32>
    %46 = tpu.matmul %45, %40, %cst_23 {dimension_numbers = #tpu.dot_dimension_numbers<[1], [0], [0], [1], [0, 0, 1, 1], [], []>} : vector<4x32xbf16>, vector<32x128xbf16>, vector<4x128xf32> -> vector<4x128xf32>
    %47 = arith.addf %44, %46 : vector<4x128xf32>
    %48 = vector.broadcast %42 : vector<1x128xf32> to vector<4x128xf32>
    %49 = arith.addf %47, %48 : vector<4x128xf32>
    %50 = vector.extract_strided_slice %49 {offsets = [0, 0], sizes = [4, 96], strides = [1, 1]} : vector<4x128xf32> to vector<4x96xf32>
    %51 = arith.negf %50 : vector<4x96xf32>
    %52 = math.exp %51 : vector<4x96xf32>
    %cst_24 = arith.constant 1.000000e+00 : f32
    %53 = vector.broadcast %cst_24 : f32 to vector<4x96xf32>
    %54 = arith.addf %53, %52 : vector<4x96xf32>
    %55 = arith.divf %53, %54 : vector<4x96xf32>
    %56 = vector.extract_strided_slice %49 {offsets = [0, 96], sizes = [4, 32], strides = [1, 1]} : vector<4x128xf32> to vector<4x32xf32>
    %57 = math.tanh %56 : vector<4x32xf32>
    %58 = vector.extract_strided_slice %55 {offsets = [0, 0], sizes = [4, 32], strides = [1, 1]} : vector<4x96xf32> to vector<4x32xf32>
    %59 = vector.extract_strided_slice %55 {offsets = [0, 32], sizes = [4, 32], strides = [1, 1]} : vector<4x96xf32> to vector<4x32xf32>
    %60 = vector.extract_strided_slice %55 {offsets = [0, 64], sizes = [4, 32], strides = [1, 1]} : vector<4x96xf32> to vector<4x32xf32>
    %61 = arith.mulf %59, %36 : vector<4x32xf32>
    %62 = arith.mulf %58, %57 : vector<4x32xf32>
    %63 = arith.addf %61, %62 : vector<4x32xf32>
    %64 = math.tanh %63 : vector<4x32xf32>
    %65 = arith.mulf %60, %64 : vector<4x32xf32>
    %66 = tpu.concatenate %34, %65, %32, %63 in 1 : vector<4x32xf32>, vector<4x32xf32>, vector<4x32xf32>, vector<4x32xf32> -> vector<4x128xf32>
    %c0_25 = arith.constant 0 : index
    %c0_26 = arith.constant 0 : index
    %67 = vector.load %arg8[%c0_25, %c0_26] : memref<4x128xf32, #tpu.memory_space<vmem>>, vector<4x128xf32>
    tpu.vector_store %arg8[%c0_25, %c0_26], %66 {strides = array<i32>} : memref<4x128xf32, #tpu.memory_space<vmem>>, vector<4x128xf32>,
    return
  }
  func.func @transform_0(%arg0: i32) -> (i32, i32, i32) {
    %c0_i32 = arith.constant 0 : i32
    %c0_i32_0 = arith.constant 0 : i32
    %c0_i32_1 = arith.constant 0 : i32
    return %arg0, %c0_i32, %c0_i32_0 : i32, i32, i32
  }
  func.func @transform_1(%arg0: i32) -> (i32, i32) {
    %c0_i32 = arith.constant 0 : i32
    %c0_i32_0 = arith.constant 0 : i32
    %c0_i32_1 = arith.constant 0 : i32
    return %c0_i32, %c0_i32_0 : i32, i32
  }
  func.func @transform_2(%arg0: i32) -> (i32, i32) {
    %c0_i32 = arith.constant 0 : i32
    %c0_i32_0 = arith.constant 0 : i32
    %c0_i32_1 = arith.constant 0 : i32
    return %c0_i32, %c0_i32_0 : i32, i32
  }
  func.func @transform_3(%arg0: i32) -> (i32, i32) {
    %c0_i32 = arith.constant 0 : i32
    %c0_i32_0 = arith.constant 0 : i32
    %c0_i32_1 = arith.constant 0 : i32
    return %c0_i32, %c0_i32_0 : i32, i32
  }
  func.func @transform_4(%arg0: i32) -> (i32, i32, i32) {
    %c0_i32 = arith.constant 0 : i32
    %c0_i32_0 = arith.constant 0 : i32
    %c0_i32_1 = arith.constant 0 : i32
    %c0_i32_2 = arith.constant 0 : i32
    return %c0_i32, %c0_i32_0, %c0_i32_1 : i32, i32, i32
  }
  func.func @transform_5(%arg0: i32) -> (i32, i32, i32) {
    %c0_i32 = arith.constant 0 : i32
    %c0_i32_0 = arith.constant 0 : i32
    %c0_i32_1 = arith.constant 0 : i32
    %c0_i32_2 = arith.constant 0 : i32
    return %c0_i32, %c0_i32_0, %c0_i32_1 : i32, i32, i32
  }
  func.func @transform_6(%arg0: i32) -> (i32, i32, i32) {
    %c0_i32 = arith.constant 0 : i32
    %c0_i32_0 = arith.constant 0 : i32
    %c0_i32_1 = arith.constant 0 : i32
    %c0_i32_2 = arith.constant 0 : i32
    return %c0_i32, %c0_i32_0, %c0_i32_1 : i32, i32, i32
  }
  func.func @transform_7(%arg0: i32) -> (i32, i32) {
    %c0_i32 = arith.constant 0 : i32
    %c0_i32_0 = arith.constant 0 : i32
    %c0_i32_1 = arith.constant 0 : i32
    return %c0_i32, %c0_i32_0 : i32, i32
  }
}

</mosaic_0001>

<bundles_post_ra>
// kernel: _lstm_forward_fused.1
= control target key start
LH: loop header
LB: loop body
LE: loop exit
PB: predicated region body
PF: predicated region fallthrough
CT: control target
= control target key end

     0   :  { %v457_v0 = vmov 0.0   ;;  %vm458_vm0 = vmmov 0   ;;  %vm106_vm1 = vcmask 130048   ;;  %vm56_vm2 = vcmask 261120   ;;  %s459_s13 = smov 32   ;;  %s460_s14 = smov 96   ;;  %s577_s2 = inlined_call_operand.vmem [shape: bf16[16,128], index: 2, kind: input, shape index: {}]   ;;  %s578_s3 = inlined_call_operand.vmem [shape: bf16[32,128], index: 3, kind: input, shape index: {}]   ;;  %s579_s0 = inlined_call_operand.vmem [shape: f32[1,4,16], index: 0, kind: input, shape index: {}]   ;;  %s580_s1 = inlined_call_operand.vmem [shape: f32[4,128], index: 1, kind: input, shape index: {}, may-alias: {1,7}]   ;;  %s581_s7 = inlined_call_operand.vmem [shape: f32[4,128], index: 7, kind: output, shape index: {}, may-alias: {1,7}]   ;;  %s582_s6 = inlined_call_operand.vmem [shape: f32[2,1,128], index: 6, kind: input, shape index: {}]   ;;  %s583_s5 = inlined_call_operand.vmem [shape: bf16[1,32,128], index: 5, kind: input, shape index: {}]   ;;  %s584_s4 = inlined_call_operand.vmem [shape: bf16[1,32,128], index: 4, kind: input, shape index: {}]  }
   0x1   :  { %407 = vmatprep.subr.bf16.mxu1 %v457_v0  ;;  %399 = vmatprep.subr.bf16.mxu0 %v457_v0  ;;  %v434_v1 = vld [vmem:[%s577_s2] sm:$0xff]   ;;  %v435_v2 = vld [vmem:[%s578_s3 + $0x8] sm:$0xff]   ;;  %vm363_vm3 = vcmask 523264   ;;  %vm365_vm4 = vcmask 785408  }
   0x2   :  { %409 = vmatprep.mubr.msk.bf16.mxu1 %vm458_vm0, %v457_v0  ;;  %403 = vmatprep.mubr.msk.bf16.mxu0 %vm458_vm0, %v457_v0  ;;  %v34_v3 = vld [vmem:[%s579_s0] sm:$0xf]  ;;  %v437_v31 = vld [vmem:[%s583_s5 + $0x8] sm:$0xff]  }
   0x3   :  { %408 = vmatpush3.bf16.msra.mxu1 %v434_v1  ;;  %400 = vmatpush3.bf16.msra.mxu0 %v435_v2  ;;  %v42_v4 = vpack.c.bf16 %v34_v3, %v34_v3  ;;  %v436_v5 = vld [vmem:[%s578_s3] sm:$0xff]   ;;  %v439_v33 = vld [vmem:[%s584_s4 + $0x8] sm:$0xff]  }
   0x4   :  { %v31_v6 = vld [vmem:[%s580_s1] sm:$0xf]  ;;  %413 = vmatprep.subr.bf16.mxu1 %v457_v0  ;;  %401 = vmatprep.subr.bf16.mxu0 %v457_v0 }
   0x5   :  { %32 = vst [vmem:[%s581_s7] sm:$0xf] %v31_v6  ;;  %v377_v13 = vld [vmem:[%s582_s6] ss:$0 sm:$0xff]  ;;  %v386_v45 = vld [vmem:[%s582_s6 + $0x1] ss:$0 sm:$0xff] }
   0x6   :  { %410 = vmatmul.mubr.msk.bf16.vlgmr.msra.gmra.mxu1 %vm106_vm1, %v42_v4  ;;  %v438_v32 = vld [vmem:[%s583_s5] sm:$0xff]   ;;  %s461_s5 = smov 64  }
   0x7   :  { %417 = vmatprep.mubr.msk.bf16.mxu1 %vm458_vm0, %v457_v0  ;;  %402 = vmatpush3.bf16.msra.mxu0 %v436_v5  ;;  %v440_v34 = vld [vmem:[%s584_s4] sm:$0xff]  }
   0x8   :  { %421 = vmatprep.subr.bf16.mxu0 %v457_v0  ;;  %414 = vmatpush3.bf16.msra.mxu1 %v437_v31 }
   0x9   :  { %415 = vmatprep.subr.bf16.mxu1 %v457_v0 }
   0xc   :  { %v33_v7 = vld [vmem:[%s581_s7] sm:$0xf]  ;;  %416 = vmatpush3.bf16.msra.mxu1 %v438_v32 }
   0xd   :  { %v43_v8 = vpack.c.bf16 %v33_v7, %v33_v7 }
   0xf   :  { %404 = vmatmul.mubr.msk.bf16.vlgmr.msra.gmra.mxu0 %vm56_vm2, %v43_v8 }
  0x10   :  { %425 = vmatprep.mubr.msk.bf16.mxu0 %vm458_vm0, %v457_v0  ;;  %422 = vmatpush3.bf16.msra.mxu0 %v439_v33 }
  0x11   :  { %423 = vmatprep.subr.bf16.mxu0 %v457_v0 }
  0x14   :  { %424 = vmatpush3.bf16.msra.mxu0 %v440_v34 }
  0xc6   :  { %v144_v9 = vpop.f32.mrf.mxu1 }
  0xc8   :  { %v411_v10 = vpop.f32.mrf.mxu1 }
  0xca   :  { %v147_v11 = vpop.f32.mrf.mxu1 }
  0xcc   :  { %v412_v12 = vpop.f32.mrf.mxu1 }
  0xcf   :  { %v94_v14 = vpop.f32.mrf.mxu0 }
  0xd0   :  { %v145_v15 = vadd.f32 %v144_v9, %v94_v14 }
  0xd1   :  { %v405_v16 = vpop.f32.mrf.mxu0 }
  0xd2   :  { %v156_v17 = vadd.f32 %v377_v13, %v145_v15 }
  0xd3   :  { %v97_v18 = vpop.f32.mrf.mxu0 }
  0xd4   :  { %441 = vtanh.f32 %v156_v17  ;;  %v378_v21 = vmul.f32 -1.442695, %v156_v17 }
  0xd5   :  { %v406_v19 = vpop.f32.mrf.mxu0 }
  0xd6   :  { %443 = vpow2.f32 %v378_v21 }
  0xe1   :  { %v442_v20 = vpop.eup %441 }
  0xe2   :  { %170 = vrot.lane.b32.xlu0 %v442_v20, %s459_s13 }
  0xe3   :  { %v444_v22 = vpop.eup %443 }
  0xe4   :  { %v160_v23 = vadd.f32 1.0, %v444_v22 }
  0xe6   :  { %165 = vrot.lane.b32.xlu0 %v33_v7, %s460_s14  ;;  %445 = vrcp.f32 %v160_v23 }
  0xea   :  { %197 = vrot.lane.b32.xlu0 %v43_v8, %s460_s14 }
  0xf3   :  { %v446_v24 = vpop.eup %445 }
 0x154   :  { %v171_v25 = vpop.permute.xlu0 %170 }
 0x155   :  { %v173_v26 = vmul.f32 %v446_v24, %v171_v25 }
 0x157   :  { %175 = vrot.lane.b32.xlu1 %v173_v26, %s459_s13 }
 0x158   :  { %v166_v27 = vpop.permute.xlu0 %165 }
 0x159   :  { %v168_v28 = vmul.f32 %v446_v24, %v166_v27 }
 0x15c   :  { %v198_v35 = vpop.permute.xlu0 %197 }
 0x15d   :  { %418 = vmatmul.mubr.msk.bf16.vlgmr.msra.gmra.mxu1 %vm56_vm2, %v198_v35 }
 0x1c9   :  { %v176_v29 = vpop.permute.xlu1 %175 }
 0x1ca   :  { %v178_v30 = vadd.f32 %v176_v29, %v168_v28 }
 0x1cc   :  { %447 = vtanh.f32 %v178_v30 }
 0x1d9   :  { %v448_v36 = vpop.eup %447 }
 0x1da   :  { %181 = vrot.lane.b32.xlu1 %v448_v36, %s459_s13 }
 0x21d   :  { %v248_v40 = vpop.f32.mrf.mxu1 }
 0x21f   :  { %v419_v41 = vpop.f32.mrf.mxu1 }
 0x221   :  { %v251_v42 = vpop.f32.mrf.mxu1 }
 0x223   :  { %v420_v43 = vpop.f32.mrf.mxu1 }
 0x24c   :  { %v182_v37 = vpop.permute.xlu1 %181 }
 0x24d   :  { %v184_v38 = vmul.f32 %v446_v24, %v182_v37 }
 0x24f   :  { %v195_v39 = vpack.c.bf16 %v184_v38, %v184_v38 }
 0x251   :  { %255 = vrot.lane.b32.xlu1 %v195_v39, %s461_s5 }
 0x255   :  { %326 = vrot.lane.b32.xlu1 %v33_v7, %s461_s5 }
 0x2c3   :  { %v256_v44 = vpop.permute.xlu1 %255 }
 0x2c4   :  { %426 = vmatmul.mubr.msk.bf16.vlgmr.msra.gmra.mxu0 %vm56_vm2, %v256_v44 }
 0x2c7   :  { %v327_v59 = vpop.permute.xlu1 %326 }
 0x384   :  { %v306_v46 = vpop.f32.mrf.mxu0 }
 0x385   :  { %v307_v47 = vadd.f32 %v306_v46, %v248_v40 }
 0x386   :  { %v427_v48 = vpop.f32.mrf.mxu0 }
 0x387   :  { %v318_v49 = vadd.f32 %v386_v45, %v307_v47 }
 0x388   :  { %v309_v50 = vpop.f32.mrf.mxu0 }
 0x389   :  { %449 = vtanh.f32 %v318_v49  ;;  %v387_v53 = vmul.f32 -1.442695, %v318_v49 }
 0x38a   :  { %v428_v51 = vpop.f32.mrf.mxu0 }
 0x38b   :  { %451 = vpow2.f32 %v387_v53 }
 0x396   :  { %v450_v52 = vpop.eup %449 }
 0x397   :  { %331 = vrot.lane.b32.xlu0 %v450_v52, %s459_s13 }
 0x398   :  { %v452_v54 = vpop.eup %451 }
 0x399   :  { %v322_v55 = vadd.f32 1.0, %v452_v54 }
 0x39b   :  { %453 = vrcp.f32 %v322_v55 }
 0x3a8   :  { %v454_v56 = vpop.eup %453 }
 0x3a9   :  { %v329_v60 = vmul.f32 %v454_v56, %v327_v59 }
 0x409   :  { %v332_v57 = vpop.permute.xlu0 %331 }
 0x40a   :  { %v334_v58 = vmul.f32 %v454_v56, %v332_v57 }
 0x40c   :  { %336 = vrot.lane.b32.xlu0 %v334_v58, %s459_s13 }
 0x410   :  { %347 = vrot.lane.b32.xlu0 %v184_v38, %s461_s5 }
 0x414   :  { %355 = vrot.lane.b32.xlu0 %v178_v30, %s459_s13 }
 0x47e   :  { %v337_v61 = vpop.permute.xlu0 %336 }
 0x47f   :  { %v339_v62 = vadd.f32 %v337_v61, %v329_v60 }
 0x481   :  { %455 = vtanh.f32 %v339_v62 }
 0x482   :  { %v348_v2 = vpop.permute.xlu0 %347 }
 0x486   :  { %v356_v5 = vpop.permute.xlu0 %355 }
 0x48e   :  { %v456_v63 = vpop.eup %455 }
 0x48f   :  { %342 = vrot.lane.b32.xlu1 %v456_v63, %s459_s13 }
 0x501   :  { %v343_v0 = vpop.permute.xlu1 %342 }
 0x502   :  { %v345_v1 = vmul.f32 %v454_v56, %v343_v0 }
 0x504   :  { %351 = vrot.lane.b32.xlu1 %v345_v1, %s460_s14 }
 0x508   :  { %359 = vrot.lane.b32.xlu1 %v339_v62, %s461_s5 }
 0x576   :  { %v352_v3 = vpop.permute.xlu1 %351 }
 0x577   :  { %v362_v4 = vsel %vm56_vm2, %v348_v2, %v352_v3 }
 0x578   :  { %v364_v6 = vsel %vm363_vm3, %v362_v4, %v356_v5 }
 0x57a   :  { %v360_v7 = vpop.permute.xlu1 %359 }
 0x57b   :  { %v366_v8 = vsel %vm365_vm4, %v364_v6, %v360_v7 }
 0x57c   :  { %367 = vst [vmem:[%s581_s7] sm:$0xf] %v366_v8 }

</bundles_post_ra>
